<compile_context>
chip_gen: v7x
topology: tpu7x:2x2x1
jax: 0.10.0
libtpu: 0.0.40
codegen_flags: <defaults>
</compile_context>

<pallas_src>
import functools

import jax
import jax.numpy as jnp
from jax import lax
from jax.experimental import pallas as pl
from jax.experimental.pallas import tpu as pltpu


def _round_up(x, m):
    return (x + m - 1) // m * m


def _make_rnn_kernel(seq_len, unroll, compute_dtype):
    """Builds the single-invocation recurrence + FC kernel.

    Refs (one batch tile, padded shapes):
      xw_ref : (S, bt, Hp)  precomputed x@W_ih^T + (b_ih+b_hh) for this tile
      whh_ref: (Hp, Hp)     hidden->hidden weight (transposed, padded)
      wfc_ref: (Hp, Op)     final Linear weight (transposed, padded)
      bfc_ref: (1, Op)      final Linear bias (padded, f32)
      out_ref: (bt, Op)     fc(final hidden state)
    """

    def kernel(xw_ref, whh_ref, wfc_ref, bfc_ref, out_ref):
        bt = out_ref.shape[0]
        hp = whh_ref.shape[0]

        # Weights stay resident; load once before the serial loop.
        whh = whh_ref[...]

        h0 = jnp.zeros((bt, hp), jnp.float32)

        def step(t, h):
            # Recurrent matmul on the MXU (f32 accumulation); tanh/add in f32.
            pre = xw_ref[t].astype(jnp.float32) + jnp.dot(
                h.astype(compute_dtype), whh,
                preferred_element_type=jnp.float32)
            return jnp.tanh(pre)

        h_last = lax.fori_loop(0, seq_len, step, h0, unroll=unroll)

        # Final Linear, once, lane-dense (Op is a multiple of 128).
        out_ref[...] = (
            jnp.dot(h_last.astype(compute_dtype), wfc_ref[...],
                    preferred_element_type=jnp.float32)
            + bfc_ref[...]
        ).astype(out_ref.dtype)

    return kernel


def rnn_forward(tokens, emb_table, w_ih, w_hh, b_ih, b_hh, w_fc, b_fc,
                *, batch_tile=None, compute_dtype=jnp.float32):
    """tokens: [S, B] int32.  Returns fc(final hidden state): [B, output_dim]."""
    # ---- XLA glue: embedding gather + hoisted input projection ------------
    embedded = jnp.take(emb_table, tokens, axis=0).astype(jnp.float32)  # [S,B,E]
    S, B, E = embedded.shape
    H = w_hh.shape[0]
    O = w_fc.shape[0]

    # One big parallel matmul for all timesteps (both RNN biases folded in).
    xw = embedded.reshape(S * B, E) @ w_ih.T + (b_ih + b_hh)
    xw = xw.reshape(S, B, H)

    # ---- Pad to sublane/lane-aligned tiles ---------------------------------
    Bp = _round_up(max(B, 1), 8)
    Hp = _round_up(H, 128)
    Op = _round_up(O, 128)

    xw_p = jnp.zeros((S, Bp, Hp), compute_dtype)
    xw_p = xw_p.at[:, :B, :H].set(xw.astype(compute_dtype))
    whh_p = jnp.zeros((Hp, Hp), compute_dtype).at[:H, :H].set(
        w_hh.T.astype(compute_dtype))
    wfc_p = jnp.zeros((Hp, Op), compute_dtype).at[:H, :O].set(
        w_fc.T.astype(compute_dtype))
    bfc_p = jnp.zeros((1, Op), jnp.float32).at[0, :O].set(b_fc)

    # Batch tiling: one program per batch tile; "parallel" so v7x's two
    # TensorCores can each run an independent recurrence when Bp//bt >= 2.
    bt = Bp if batch_tile is None else _round_up(batch_tile, 8)
    bt = min(bt, Bp)
    if Bp % bt != 0:
        bt = Bp
    grid = (Bp // bt,)

    unroll = True if S <= 32 else 4
    kernel = _make_rnn_kernel(S, unroll, compute_dtype)

    out_p = pl.pallas_call(
        kernel,
        out_shape=jax.ShapeDtypeStruct((Bp, Op), jnp.float32),
        grid_spec=pltpu.PrefetchScalarGridSpec(
            num_scalar_prefetch=0,
            grid=grid,
            in_specs=[
                pl.BlockSpec((S, bt, Hp), lambda i: (0, i, 0)),  # xw (batch tile)
                pl.BlockSpec((Hp, Hp), lambda i: (0, 0)),        # W_hh^T
                pl.BlockSpec((Hp, Op), lambda i: (0, 0)),        # W_fc^T
                pl.BlockSpec((1, Op), lambda i: (0, 0)),         # b_fc
            ],
            out_specs=pl.BlockSpec((bt, Op), lambda i: (i, 0)),
        ),
        compiler_params=pltpu.CompilerParams(
            # Batch tiles are independent -> parallel (megacore on v7x).
            dimension_semantics=("parallel",),
            # Default scoped VMEM limit is ample for these shapes; raise
            # vmem_limit_bytes here if S*bt*Hp grows (esp. on v7x's 64 MiB).
        ),
    )(xw_p, whh_p, wfc_p, bfc_p)

    return out_p[:B, :O]


def rnn_reference(tokens, emb_table, w_ih, w_hh, b_ih, b_hh, w_fc, b_fc):
    """Pure-JAX reference matching PyTorch nn.RNN semantics (f32)."""
    embedded = jnp.take(emb_table, tokens, axis=0)  # [S, B, E]
    B = embedded.shape[1]
    H = w_hh.shape[0]
    h0 = jnp.zeros((B, H), jnp.float32)

    def step(h, x_t):
        h_new = jnp.tanh(x_t @ w_ih.T + b_ih + h @ w_hh.T + b_hh)
        return h_new, h_new

    h_last, _ = lax.scan(step, h0, embedded)
    return h_last @ w_fc.T + b_fc


if __name__ == "__main__":
    # Small shapes consistent with the module's forward.
    vocab_size = 50
    embedding_dim = 16
    hidden_dim = 32
    output_dim = 4
    seq_len = 8
    batch = 2

    key = jax.random.PRNGKey(0)
    k_tok, k_emb, k_wih, k_whh, k_bih, k_bhh, k_wfc, k_bfc = jax.random.split(key, 8)

    tokens = jax.random.randint(k_tok, (seq_len, batch), 0, vocab_size, dtype=jnp.int32)

    scale = 1.0 / jnp.sqrt(hidden_dim)
    emb_table = jax.random.normal(k_emb, (vocab_size, embedding_dim), jnp.float32)
    w_ih = jax.random.uniform(k_wih, (hidden_dim, embedding_dim), jnp.float32, -scale, scale)
    w_hh = jax.random.uniform(k_whh, (hidden_dim, hidden_dim), jnp.float32, -scale, scale)
    b_ih = jax.random.uniform(k_bih, (hidden_dim,), jnp.float32, -scale, scale)
    b_hh = jax.random.uniform(k_bhh, (hidden_dim,), jnp.float32, -scale, scale)
    w_fc = jax.random.uniform(k_wfc, (output_dim, hidden_dim), jnp.float32, -scale, scale)
    b_fc = jax.random.uniform(k_bfc, (output_dim,), jnp.float32, -scale, scale)

    ref = rnn_reference(tokens, emb_table, w_ih, w_hh, b_ih, b_hh, w_fc, b_fc)

    # f32 path: must match PyTorch/f32 reference tightly.
    out = rnn_forward(tokens, emb_table, w_ih, w_hh, b_ih, b_hh, w_fc, b_fc)
    out = jax.block_until_ready(out)
    assert out.shape == (batch, output_dim)
    assert jnp.allclose(out, ref, atol=1e-5, rtol=1e-5), (out, ref)

    # bf16-matmul path (f32 accumulation): looser tolerance.
    out_bf16 = rnn_forward(tokens, emb_table, w_ih, w_hh, b_ih, b_hh, w_fc, b_fc,
                           compute_dtype=jnp.bfloat16)
    out_bf16 = jax.block_until_ready(out_bf16)
    assert out_bf16.shape == (batch, output_dim)
    assert jnp.allclose(out_bf16, ref, atol=1e-1, rtol=1e-1), (out_bf16, ref)

    print("KERNEL_OK")
</pallas_src>

<mosaic_0001>
module attributes {stable_mosaic.version = 11 : i64} {
  func.func @kernel(%arg0: i32, %arg1: memref<8x8x128xf32, #tpu.memory_space<vmem>>, %arg2: memref<128x128xf32, #tpu.memory_space<vmem>>, %arg3: memref<128x128xf32, #tpu.memory_space<vmem>>, %arg4: memref<1x128xf32, #tpu.memory_space<vmem>>, %arg5: memref<8x128xf32, #tpu.memory_space<vmem>>) attributes {dimension_semantics = [#tpu.dimension_semantics<parallel>], iteration_bounds = array<i64: 1>, scalar_prefetch = 0 : i64, scratch_operands = 0 : i64, tpu.core_type = #tpu.core_type<tc>, window_params = [{transform_indices = @transform_0, window_bounds = array<i64: 8, 8, 128>}, {pipeline_mode = #tpu.pipeline_mode<synchronous>, transform_indices = @transform_1, window_bounds = array<i64: 128, 128>}, {pipeline_mode = #tpu.pipeline_mode<synchronous>, transform_indices = @transform_2, window_bounds = array<i64: 128, 128>}, {pipeline_mode = #tpu.pipeline_mode<synchronous>, transform_indices = @transform_3, window_bounds = array<i64: 1, 128>}, {transform_indices = @transform_4, window_bounds = array<i64: 8, 128>}]} {
    %c0 = arith.constant 0 : index
    %c0_0 = arith.constant 0 : index
    %0 = vector.load %arg2[%c0, %c0_0] : memref<128x128xf32, #tpu.memory_space<vmem>>, vector<128x128xf32>
    %cst = arith.constant 0.000000e+00 : f32
    %1 = vector.broadcast %cst : f32 to vector<8x128xf32>
    %c0_i32 = arith.constant 0 : i32
    %2 = arith.index_cast %c0_i32 : i32 to index
    %c0_1 = arith.constant 0 : index
    %c0_2 = arith.constant 0 : index
    %3 = vector.load %arg1[%2, %c0_1, %c0_2] : memref<8x8x128xf32, #tpu.memory_space<vmem>>, vector<1x8x128xf32>
    %4 = vector.shape_cast %3 : vector<1x8x128xf32> to vector<8x128xf32>
    %cst_3 = arith.constant dense<0.000000e+00> : vector<8x128xf32>
    %5 = tpu.matmul %1, %0, %cst_3 {dimension_numbers = #tpu.dot_dimension_numbers<[1], [0], [0], [1], [0, 0, 1, 1], [], []>} : vector<8x128xf32>, vector<128x128xf32>, vector<8x128xf32> -> vector<8x128xf32>
    %6 = arith.addf %4, %5 : vector<8x128xf32>
    %7 = math.tanh %6 : vector<8x128xf32>
    %c1_i32 = arith.constant 1 : i32
    %8 = arith.index_cast %c1_i32 : i32 to index
    %c0_4 = arith.constant 0 : index
    %c0_5 = arith.constant 0 : index
    %9 = vector.load %arg1[%8, %c0_4, %c0_5] : memref<8x8x128xf32, #tpu.memory_space<vmem>>, vector<1x8x128xf32>
    %10 = vector.shape_cast %9 : vector<1x8x128xf32> to vector<8x128xf32>
    %cst_6 = arith.constant dense<0.000000e+00> : vector<8x128xf32>
    %11 = tpu.matmul %7, %0, %cst_6 {dimension_numbers = #tpu.dot_dimension_numbers<[1], [0], [0], [1], [0, 0, 1, 1], [], []>} : vector<8x128xf32>, vector<128x128xf32>, vector<8x128xf32> -> vector<8x128xf32>
    %12 = arith.addf %10, %11 : vector<8x128xf32>
    %13 = math.tanh %12 : vector<8x128xf32>
    %c2_i32 = arith.constant 2 : i32
    %14 = arith.index_cast %c2_i32 : i32 to index
    %c0_7 = arith.constant 0 : index
    %c0_8 = arith.constant 0 : index
    %15 = vector.load %arg1[%14, %c0_7, %c0_8] : memref<8x8x128xf32, #tpu.memory_space<vmem>>, vector<1x8x128xf32>
    %16 = vector.shape_cast %15 : vector<1x8x128xf32> to vector<8x128xf32>
    %cst_9 = arith.constant dense<0.000000e+00> : vector<8x128xf32>
    %17 = tpu.matmul %13, %0, %cst_9 {dimension_numbers = #tpu.dot_dimension_numbers<[1], [0], [0], [1], [0, 0, 1, 1], [], []>} : vector<8x128xf32>, vector<128x128xf32>, vector<8x128xf32> -> vector<8x128xf32>
    %18 = arith.addf %16, %17 : vector<8x128xf32>
    %19 = math.tanh %18 : vector<8x128xf32>
    %c3_i32 = arith.constant 3 : i32
    %20 = arith.index_cast %c3_i32 : i32 to index
    %c0_10 = arith.constant 0 : index
    %c0_11 = arith.constant 0 : index
    %21 = vector.load %arg1[%20, %c0_10, %c0_11] : memref<8x8x128xf32, #tpu.memory_space<vmem>>, vector<1x8x128xf32>
    %22 = vector.shape_cast %21 : vector<1x8x128xf32> to vector<8x128xf32>
    %cst_12 = arith.constant dense<0.000000e+00> : vector<8x128xf32>
    %23 = tpu.matmul %19, %0, %cst_12 {dimension_numbers = #tpu.dot_dimension_numbers<[1], [0], [0], [1], [0, 0, 1, 1], [], []>} : vector<8x128xf32>, vector<128x128xf32>, vector<8x128xf32> -> vector<8x128xf32>
    %24 = arith.addf %22, %23 : vector<8x128xf32>
    %25 = math.tanh %24 : vector<8x128xf32>
    %c4_i32 = arith.constant 4 : i32
    %26 = arith.index_cast %c4_i32 : i32 to index
    %c0_13 = arith.constant 0 : index
    %c0_14 = arith.constant 0 : index
    %27 = vector.load %arg1[%26, %c0_13, %c0_14] : memref<8x8x128xf32, #tpu.memory_space<vmem>>, vector<1x8x128xf32>
    %28 = vector.shape_cast %27 : vector<1x8x128xf32> to vector<8x128xf32>
    %cst_15 = arith.constant dense<0.000000e+00> : vector<8x128xf32>
    %29 = tpu.matmul %25, %0, %cst_15 {dimension_numbers = #tpu.dot_dimension_numbers<[1], [0], [0], [1], [0, 0, 1, 1], [], []>} : vector<8x128xf32>, vector<128x128xf32>, vector<8x128xf32> -> vector<8x128xf32>
    %30 = arith.addf %28, %29 : vector<8x128xf32>
    %31 = math.tanh %30 : vector<8x128xf32>
    %c5_i32 = arith.constant 5 : i32
    %32 = arith.index_cast %c5_i32 : i32 to index
    %c0_16 = arith.constant 0 : index
    %c0_17 = arith.constant 0 : index
    %33 = vector.load %arg1[%32, %c0_16, %c0_17] : memref<8x8x128xf32, #tpu.memory_space<vmem>>, vector<1x8x128xf32>
    %34 = vector.shape_cast %33 : vector<1x8x128xf32> to vector<8x128xf32>
    %cst_18 = arith.constant dense<0.000000e+00> : vector<8x128xf32>
    %35 = tpu.matmul %31, %0, %cst_18 {dimension_numbers = #tpu.dot_dimension_numbers<[1], [0], [0], [1], [0, 0, 1, 1], [], []>} : vector<8x128xf32>, vector<128x128xf32>, vector<8x128xf32> -> vector<8x128xf32>
    %36 = arith.addf %34, %35 : vector<8x128xf32>
    %37 = math.tanh %36 : vector<8x128xf32>
    %c6_i32 = arith.constant 6 : i32
    %38 = arith.index_cast %c6_i32 : i32 to index
    %c0_19 = arith.constant 0 : index
    %c0_20 = arith.constant 0 : index
    %39 = vector.load %arg1[%38, %c0_19, %c0_20] : memref<8x8x128xf32, #tpu.memory_space<vmem>>, vector<1x8x128xf32>
    %40 = vector.shape_cast %39 : vector<1x8x128xf32> to vector<8x128xf32>
    %cst_21 = arith.constant dense<0.000000e+00> : vector<8x128xf32>
    %41 = tpu.matmul %37, %0, %cst_21 {dimension_numbers = #tpu.dot_dimension_numbers<[1], [0], [0], [1], [0, 0, 1, 1], [], []>} : vector<8x128xf32>, vector<128x128xf32>, vector<8x128xf32> -> vector<8x128xf32>
    %42 = arith.addf %40, %41 : vector<8x128xf32>
    %43 = math.tanh %42 : vector<8x128xf32>
    %c7_i32 = arith.constant 7 : i32
    %44 = arith.index_cast %c7_i32 : i32 to index
    %c0_22 = arith.constant 0 : index
    %c0_23 = arith.constant 0 : index
    %45 = vector.load %arg1[%44, %c0_22, %c0_23] : memref<8x8x128xf32, #tpu.memory_space<vmem>>, vector<1x8x128xf32>
    %46 = vector.shape_cast %45 : vector<1x8x128xf32> to vector<8x128xf32>
    %cst_24 = arith.constant dense<0.000000e+00> : vector<8x128xf32>
    %47 = tpu.matmul %43, %0, %cst_24 {dimension_numbers = #tpu.dot_dimension_numbers<[1], [0], [0], [1], [0, 0, 1, 1], [], []>} : vector<8x128xf32>, vector<128x128xf32>, vector<8x128xf32> -> vector<8x128xf32>
    %48 = arith.addf %46, %47 : vector<8x128xf32>
    %49 = math.tanh %48 : vector<8x128xf32>
    %c8_i32 = arith.constant 8 : i32
    %c0_25 = arith.constant 0 : index
    %c0_26 = arith.constant 0 : index
    %50 = vector.load %arg3[%c0_25, %c0_26] : memref<128x128xf32, #tpu.memory_space<vmem>>, vector<128x128xf32>
    %cst_27 = arith.constant dense<0.000000e+00> : vector<8x128xf32>
    %51 = tpu.matmul %49, %50, %cst_27 {dimension_numbers = #tpu.dot_dimension_numbers<[1], [0], [0], [1], [0, 0, 1, 1], [], []>} : vector<8x128xf32>, vector<128x128xf32>, vector<8x128xf32> -> vector<8x128xf32>
    %c0_28 = arith.constant 0 : index
    %c0_29 = arith.constant 0 : index
    %52 = vector.load %arg4[%c0_28, %c0_29] : memref<1x128xf32, #tpu.memory_space<vmem>>, vector<1x128xf32>
    %53 = vector.broadcast %52 : vector<1x128xf32> to vector<8x128xf32>
    %54 = arith.addf %51, %53 : vector<8x128xf32>
    %c0_30 = arith.constant 0 : index
    %c0_31 = arith.constant 0 : index
    %55 = vector.load %arg5[%c0_30, %c0_31] : memref<8x128xf32, #tpu.memory_space<vmem>>, vector<8x128xf32>
    tpu.vector_store %arg5[%c0_30, %c0_31], %54 {strides = array<i32>} : memref<8x128xf32, #tpu.memory_space<vmem>>, vector<8x128xf32>,
    return
  }
  func.func @transform_0(%arg0: i32) -> (i32, i32, i32) {
    %c0_i32 = arith.constant 0 : i32
    %c0_i32_0 = arith.constant 0 : i32
    %c0_i32_1 = arith.constant 0 : i32
    return %c0_i32, %arg0, %c0_i32_0 : i32, i32, i32
  }
  func.func @transform_1(%arg0: i32) -> (i32, i32) {
    %c0_i32 = arith.constant 0 : i32
    %c0_i32_0 = arith.constant 0 : i32
    %c0_i32_1 = arith.constant 0 : i32
    return %c0_i32, %c0_i32_0 : i32, i32
  }
  func.func @transform_2(%arg0: i32) -> (i32, i32) {
    %c0_i32 = arith.constant 0 : i32
    %c0_i32_0 = arith.constant 0 : i32
    %c0_i32_1 = arith.constant 0 : i32
    return %c0_i32, %c0_i32_0 : i32, i32
  }
  func.func @transform_3(%arg0: i32) -> (i32, i32) {
    %c0_i32 = arith.constant 0 : i32
    %c0_i32_0 = arith.constant 0 : i32
    %c0_i32_1 = arith.constant 0 : i32
    return %c0_i32, %c0_i32_0 : i32, i32
  }
  func.func @transform_4(%arg0: i32) -> (i32, i32) {
    %c0_i32 = arith.constant 0 : i32
    %c0_i32_0 = arith.constant 0 : i32
    return %arg0, %c0_i32 : i32, i32
  }
}

</mosaic_0001>

<bundles_post_ra>
// kernel: tpu_custom_call.1
= control target key start
LH: loop header
LB: loop body
LE: loop exit
PB: predicated region body
PF: predicated region fallthrough
CT: control target
= control target key end

     0   :  { %9 = vsyncpa [#allocation3], 0  ;;  %s1852_s0 = inlined_call_operand.hbm [shape: f32[8,8,128], index: 0, kind: input, shape index: {}]   ;;  %s1853_s1 = inlined_call_operand.hbm [shape: f32[128,128], index: 1, kind: input, shape index: {}]   ;;  %s1854_s2 = inlined_call_operand.hbm [shape: f32[128,128], index: 2, kind: input, shape index: {}]   ;;  %s1855_s3 = inlined_call_operand.vmem [shape: f32[1,128], index: 3, kind: input, shape index: {}]   ;;  %s1856_s4 = inlined_call_operand.hbm [shape: f32[8,128], index: 4, kind: output, shape index: {}]  }
   0x1   :  { %10 = vsyncpa [#allocation6], 0 }
   0x2   :  { %11 = vsyncpa [#allocation4], 0  ;;  %s1580_s15 = smov [#allocation5]   ;;  %s1581_s17 = smov [#allocation2]  }
   0x3   :  { %s29_s16 = sshll.u32 %s1580_s15, 4  ;;  %s17_s18 = sshll.u32 %s1581_s17, 4  ;;  %s30_s16 = int_to_ptr.vmem [resolvable:$true] %s29_s16  ;;  %s1614_s18 = int_to_ptr.vmem [resolvable:$true] %s17_s18 }
   0x4   :  { %s1486_s21 = scalar_lea.hbm %s1853_s1, 2048 }
   0x5   :  { %p1487_p0 = scmp.ne.s32.totalorder %s1853_s1, %s1486_s21  ;;  %p1490_p1 = scmp.lt.u32.totalorder %s1486_s21, %s1853_s1 }
   0x7   :  { %p1492_p2 = pnand %p1490_p1, %p1487_p0 }
   0x9   :  { %1495 = shalt.err (!%p1492_p2)
}
   0xa   :  { %s1496_s26 = scalar_lea.vmem %s30_s16, 2048  ;;  %p1501_p4 = scmp.lt.s32.totalorder %s30_s16, %s30_s16 }
   0xb   :  { %p1497_p3 = scmp.ne.s32.totalorder %s30_s16, %s1496_s26  ;;  %p1502_p5 = scmp.lt.s32.totalorder %s1496_s26, %s1496_s26 }
   0xd   :  { %p1503_p6 = por %p1502_p5, %p1501_p4 }
   0xf   :  { %p1504_p7 = pnand %p1503_p6, %p1497_p3 }
  0x11   :  { %1507 = shalt.err (!%p1504_p7)
}
  0x12   :  { %s1582_s27 = smov 128   ;;  %s1583_s28 = smov 8  }
  0x13   :  { %35 = dma.hbm_to_vmem [thread:$0]  %s1853_s1, 2048, %s30_s16, [#allocation6], %s1582_s27, %s1582_s27, %s1583_s28  }
  0x14   :  { %s1508_s7 = scalar_lea.hbm %s1852_s0, 1024 }
  0x15   :  { %p1509_p8 = scmp.ne.s32.totalorder %s1852_s0, %s1508_s7  ;;  %p1512_p9 = scmp.lt.u32.totalorder %s1508_s7, %s1852_s0 }
  0x17   :  { %p1514_p10 = pnand %p1512_p9, %p1509_p8 }
  0x19   :  { %1517 = shalt.err (!%p1514_p10)
}
  0x1a   :  { %s1518_s12 = scalar_lea.vmem %s1614_s18, 1024  ;;  %p1523_p12 = scmp.lt.s32.totalorder %s1614_s18, %s1614_s18 }
  0x1b   :  { %p1519_p11 = scmp.ne.s32.totalorder %s1614_s18, %s1518_s12  ;;  %p1524_p13 = scmp.lt.s32.totalorder %s1518_s12, %s1518_s12 }
  0x1d   :  { %p1525_p0 = por %p1524_p13, %p1523_p12 }
  0x1f   :  { %p1526_p1 = pnand %p1525_p0, %p1519_p11 }
  0x21   :  { %1529 = shalt.err (!%p1526_p1)
}
  0x22   :  { %23 = dma.hbm_to_vmem [thread:$0]  %s1852_s0, 1024, %s1614_s18, [#allocation3], %s1582_s27, %s1582_s27, %s1583_s28  }
  0x23   :  { %s1584_s14 = smov [#allocation7]   ;;  %s1530_s19 = scalar_lea.hbm %s1854_s2, 2048 }
  0x24   :  { %s41_s15 = sshll.u32 %s1584_s14, 4  ;;  %p1531_p2 = scmp.ne.s32.totalorder %s1854_s2, %s1530_s19  ;;  %s42_s15 = int_to_ptr.vmem [resolvable:$true] %s41_s15 }
  0x25   :  { %p1534_p3 = scmp.lt.u32.totalorder %s1530_s19, %s1854_s2 }
  0x27   :  { %p1536_p4 = pnand %p1534_p3, %p1531_p2 }
  0x29   :  { %1539 = shalt.err (!%p1536_p4)
}
  0x2a   :  { %s1540_s24 = scalar_lea.vmem %s42_s15, 2048  ;;  %p1545_p6 = scmp.lt.s32.totalorder %s42_s15, %s42_s15 }
  0x2b   :  { %p1541_p5 = scmp.ne.s32.totalorder %s42_s15, %s1540_s24  ;;  %p1546_p7 = scmp.lt.s32.totalorder %s1540_s24, %s1540_s24 }
  0x2d   :  { %p1547_p8 = por %p1546_p7, %p1545_p6 }
  0x2f   :  { %p1548_p9 = pnand %p1547_p8, %p1541_p5 }
  0x31   :  { %1551 = shalt.err (!%p1548_p9)
}
  0x32   :  { %47 = dma.hbm_to_vmem [thread:$0]  %s1854_s2, 2048, %s42_s15, [#allocation6], %s1582_s27, %s1582_s27, %s1583_s28  }
  0x33   :  { %1574 = dma.done.wait [#allocation3], 1024  }
  0x34   :  { %1575 = vsyncadd [#allocation3], 4294966272 }
  0x35   :  { %1576 = dma.done.wait [#allocation6], 4096  }
  0x36   :  { %1577 = vsyncadd [#allocation6], 4294963200  ;;  %v1585_v0 = vmov 0.0|0.0   ;;  %vm1586_vm0 = vmmov 0   ;;  %v1587_v1 = vmov 0.0   ;;  %v59_v2 = vld [vmem:[#allocation5] sm:$0xff] }
  0x37   :  { %1245 = vmatprep.subr.bf16.mxu0 %v1585_v0  ;;  %962 = vmatprep.mubr.msk.f32.mxu0 %vm1586_vm0, %v1587_v1  ;;  %v60_v3 = vld [vmem:[#allocation5 + $0x8] sm:$0xff]  ;;  %v61_v4 = vld [vmem:[#allocation5 + $0x10] sm:$0xff]  ;;  %v62_v6 = vld [vmem:[#allocation5 + $0x18] sm:$0xff]  ;;  %s1588_s26 = smov [#allocation8]  }
  0x38   :  { %1269 = vmatprep.subr.bf16.mxu1 %v1585_v0  ;;  %997 = vmatprep.mubr.msk.f32.mxu1 %vm1586_vm0, %v1587_v1  ;;  %v1672_v5 = vpack.c.bf16 %v60_v3, %v59_v2  ;;  %v1675_v7 = vpack.c.bf16 %v62_v6, %v61_v4  ;;  %v63_v8 = vld [vmem:[#allocation5 + $0x20] sm:$0xff]  ;;  %v64_v9 = vld [vmem:[#allocation5 + $0x28] sm:$0xff]  ;;  %v65_v11 = vld [vmem:[#allocation5 + $0x30] sm:$0xff]  ;;  %s766_s27 = sshll.u32 %s1588_s26, 4  ;;  %s767_s27 = int_to_ptr.vmem [resolvable:$true] %s766_s27 }
  0x39   :  { %v1681_v10 = vpack.c.bf16 %v64_v9, %v63_v8  ;;  %v66_v12 = vld [vmem:[#allocation5 + $0x38] sm:$0xff]  ;;  %v67_v14 = vld [vmem:[#allocation5 + $0x40] sm:$0xff]  ;;  %v68_v15 = vld [vmem:[#allocation5 + $0x48] sm:$0xff]  ;;  %s1552_s28 = scalar_lea.vmem %s767_s27, 128  ;;  %p1557_p11 = scmp.lt.s32.totalorder %s767_s27, %s767_s27 }
  0x3a   :  { %1247 = vmatpush3.bf16.msra.mxu0 %v1672_v5  ;;  %1271 = vmatpush3.bf16.msra.mxu1 %v1672_v5  ;;  %v1687_v13 = vpack.c.bf16 %v66_v12, %v65_v11  ;;  %v1693_v16 = vpack.c.bf16 %v68_v15, %v67_v14  ;;  %v69_v17 = vld [vmem:[#allocation5 + $0x50] sm:$0xff]  ;;  %v70_v18 = vld [vmem:[#allocation5 + $0x58] sm:$0xff]  ;;  %v71_v20 = vld [vmem:[#allocation5 + $0x60] sm:$0xff]  ;;  %p1553_p10 = scmp.ne.s32.totalorder %s767_s27, %s1552_s28  ;;  %p1558_p12 = scmp.lt.s32.totalorder %s1552_s28, %s1552_s28 }
  0x3b   :  { %1248 = vmatprep.subr.bf16.mxu0 %v1585_v0  ;;  %1272 = vmatprep.subr.bf16.mxu1 %v1585_v0  ;;  %v1699_v19 = vpack.c.bf16 %v70_v18, %v69_v17  ;;  %v72_v21 = vld [vmem:[#allocation5 + $0x68] sm:$0xff]  ;;  %v73_v23 = vld [vmem:[#allocation5 + $0x70] sm:$0xff]  ;;  %v74_v24 = vld [vmem:[#allocation5 + $0x78] sm:$0xff] }
  0x3c   :  { %v1705_v22 = vpack.c.bf16 %v72_v21, %v71_v20  ;;  %v1711_v25 = vpack.c.bf16 %v74_v24, %v73_v23  ;;  %v75_v26 = vld [vmem:[#allocation2] sm:$0xff]  ;;  %v149_v31 = vld [vmem:[#allocation2 + $0x8] sm:$0xff]  ;;  %v223_v36 = vld [vmem:[#allocation2 + $0x10] sm:$0xff]  ;;  %p1559_p13 = por %p1558_p12, %p1557_p11 }
  0x3d   :  { %v297_v41 = vld [vmem:[#allocation2 + $0x18] sm:$0xff]  ;;  %v371_v46 = vld [vmem:[#allocation2 + $0x20] sm:$0xff]  ;;  %v445_v51 = vld [vmem:[#allocation2 + $0x28] sm:$0xff] }
  0x3e   :  { %1250 = vmatpush3.bf16.msra.mxu0 %v1675_v7  ;;  %1274 = vmatpush3.bf16.msra.mxu1 %v1675_v7  ;;  %v666_v56 = vld [vmem:[#allocation7] sm:$0xff]  ;;  %v667_v57 = vld [vmem:[#allocation7 + $0x8] sm:$0xff]  ;;  %v668_v58 = vld [vmem:[#allocation7 + $0x10] sm:$0xff]  ;;  %p1560_p0 = pnand %p1559_p13, %p1553_p10 }
  0x3f   :  { %1251 = vmatprep.subr.bf16.mxu0 %v1585_v0  ;;  %1275 = vmatprep.subr.bf16.mxu1 %v1585_v0  ;;  %v1438_v59 = vpack.c.bf16 %v667_v57, %v666_v56  ;;  %v669_v60 = vld [vmem:[#allocation7 + $0x18] sm:$0xff]  ;;  %v670_v62 = vld [vmem:[#allocation7 + $0x20] sm:$0xff]  ;;  %v671_v63 = vld [vmem:[#allocation7 + $0x28] sm:$0xff] }
  0x40   :  { %v1441_v61 = vpack.c.bf16 %v669_v60, %v668_v58  ;;  %v1444_v2 = vpack.c.bf16 %v671_v63, %v670_v62  ;;  %v672_v3 = vld [vmem:[#allocation7 + $0x30] sm:$0xff]  ;;  %v673_v4 = vld [vmem:[#allocation7 + $0x38] sm:$0xff]  ;;  %v675_v6 = vld [vmem:[#allocation7 + $0x48] sm:$0xff] }
  0x41   :  { %v519_v8 = vld [vmem:[#allocation2 + $0x30] sm:$0xff]  ;;  %v677_v14 = vld [vmem:[#allocation7 + $0x58] sm:$0xff]  ;;  %v679_v17 = vld [vmem:[#allocation7 + $0x68] sm:$0xff] }
  0x42   :  { %1253 = vmatpush3.bf16.msra.mxu0 %v1681_v10  ;;  %1277 = vmatpush3.bf16.msra.mxu1 %v1681_v10  ;;  %v681_v20 = vld [vmem:[#allocation7 + $0x78] sm:$0xff] }
  0x43   :  { %1254 = vmatprep.subr.bf16.mxu0 %v1585_v0  ;;  %1278 = vmatprep.subr.bf16.mxu1 %v1585_v0 }
  0x46   :  { %1256 = vmatpush3.bf16.msra.mxu0 %v1687_v13  ;;  %1280 = vmatpush3.bf16.msra.mxu1 %v1687_v13 }
  0x47   :  { %1257 = vmatprep.subr.bf16.mxu0 %v1585_v0  ;;  %1281 = vmatprep.subr.bf16.mxu1 %v1585_v0 }
  0x4a   :  { %1259 = vmatpush3.bf16.msra.mxu0 %v1693_v16  ;;  %1283 = vmatpush3.bf16.msra.mxu1 %v1693_v16 }
  0x4b   :  { %1260 = vmatprep.subr.bf16.mxu0 %v1585_v0  ;;  %1284 = vmatprep.subr.bf16.mxu1 %v1585_v0 }
  0x4e   :  { %1262 = vmatpush3.bf16.msra.mxu0 %v1699_v19  ;;  %1286 = vmatpush3.bf16.msra.mxu1 %v1699_v19 }
  0x4f   :  { %1263 = vmatprep.subr.bf16.mxu0 %v1585_v0  ;;  %1287 = vmatprep.subr.bf16.mxu1 %v1585_v0 }
  0x52   :  { %1265 = vmatpush3.bf16.msra.mxu0 %v1705_v22  ;;  %1289 = vmatpush3.bf16.msra.mxu1 %v1705_v22 }
  0x53   :  { %1266 = vmatprep.subr.bf16.mxu0 %v1585_v0  ;;  %1290 = vmatprep.subr.bf16.mxu1 %v1585_v0 }
  0x56   :  { %1268 = vmatpush3.bf16.msra.mxu0 %v1711_v25  ;;  %1292 = vmatpush3.bf16.msra.mxu1 %v1711_v25 }
  0x57   :  { %1293 = vmatprep.subr.bf16.mxu0 %v1585_v0  ;;  %1317 = vmatprep.subr.bf16.mxu1 %v1585_v0 }
  0x59   :  { %963 = vmatmul.mubr.f32.vlgmr.msra.gmra.mrb[0].mxu0 %v1587_v1 }
  0x5a   :  { %1295 = vmatpush3.bf16.msra.mxu0 %v1672_v5  ;;  %1032 = vmatprep.mubr.msk.f32.mxu0 %vm1586_vm0, %v1587_v1 }
  0x5b   :  { %1296 = vmatprep.subr.bf16.mxu0 %v1585_v0 }
  0x5e   :  { %1298 = vmatpush3.bf16.msra.mxu0 %v1675_v7 }
  0x5f   :  { %1299 = vmatprep.subr.bf16.mxu0 %v1585_v0 }
  0x62   :  { %1301 = vmatpush3.bf16.msra.mxu0 %v1681_v10 }
  0x63   :  { %1302 = vmatprep.subr.bf16.mxu0 %v1585_v0 }
  0x66   :  { %1304 = vmatpush3.bf16.msra.mxu0 %v1687_v13 }
  0x67   :  { %1305 = vmatprep.subr.bf16.mxu0 %v1585_v0 }
  0x6a   :  { %1307 = vmatpush3.bf16.msra.mxu0 %v1693_v16 }
  0x6b   :  { %1308 = vmatprep.subr.bf16.mxu0 %v1585_v0 }
  0x6e   :  { %1310 = vmatpush3.bf16.msra.mxu0 %v1699_v19 }
  0x6f   :  { %1311 = vmatprep.subr.bf16.mxu0 %v1585_v0 }
  0x72   :  { %1313 = vmatpush3.bf16.msra.mxu0 %v1705_v22 }
  0x73   :  { %1314 = vmatprep.subr.bf16.mxu0 %v1585_v0 }
  0x76   :  { %1316 = vmatpush3.bf16.msra.mxu0 %v1711_v25 }
  0x77   :  { %1341 = vmatprep.subr.bf16.mxu0 %v1585_v0 }
 0x12c   :  { %v142_v27 = vpop.f32.mrb[0].mxu0 }
 0x12d   :  { %v146_v28 = vadd.f32 %v142_v27, %v75_v26  ;;  %v964_v29 = vpop.f32.mrb[1].mxu0  ;;  %v776_v27 = vld [vmem:[%s1855_s3] ss:$0 sm:$0xff] }
 0x12f   :  { %1470 = vtanh.f32 %v146_v28 }
 0x139   :  { %v1471_v30 = vpop.eup %1470 }
 0x13a   :  { %998 = vmatmul.mubr.f32.vlgmr.msra.gmra.mrb[0].mxu1 %v1471_v30 }
 0x13b   :  { %1319 = vmatpush3.bf16.msra.mxu1 %v1672_v5  ;;  %1067 = vmatprep.mubr.msk.f32.mxu1 %vm1586_vm0, %v1587_v1 }
 0x13c   :  { %1320 = vmatprep.subr.bf16.mxu1 %v1585_v0 }
 0x13f   :  { %1322 = vmatpush3.bf16.msra.mxu1 %v1675_v7 }
 0x140   :  { %1323 = vmatprep.subr.bf16.mxu1 %v1585_v0 }
 0x143   :  { %1325 = vmatpush3.bf16.msra.mxu1 %v1681_v10 }
 0x144   :  { %1326 = vmatprep.subr.bf16.mxu1 %v1585_v0 }
 0x147   :  { %1328 = vmatpush3.bf16.msra.mxu1 %v1687_v13 }
 0x148   :  { %1329 = vmatprep.subr.bf16.mxu1 %v1585_v0 }
 0x14b   :  { %1331 = vmatpush3.bf16.msra.mxu1 %v1693_v16 }
 0x14c   :  { %1332 = vmatprep.subr.bf16.mxu1 %v1585_v0 }
 0x14f   :  { %1334 = vmatpush3.bf16.msra.mxu1 %v1699_v19 }
 0x150   :  { %1335 = vmatprep.subr.bf16.mxu1 %v1585_v0 }
 0x153   :  { %1337 = vmatpush3.bf16.msra.mxu1 %v1705_v22 }
 0x154   :  { %1338 = vmatprep.subr.bf16.mxu1 %v1585_v0 }
 0x157   :  { %1340 = vmatpush3.bf16.msra.mxu1 %v1711_v25 }
 0x158   :  { %1365 = vmatprep.subr.bf16.mxu1 %v1585_v0 }
 0x20d   :  { %v216_v32 = vpop.f32.mrb[0].mxu1 }
 0x20e   :  { %v220_v33 = vadd.f32 %v216_v32, %v149_v31  ;;  %v999_v34 = vpop.f32.mrb[1].mxu1 }
 0x210   :  { %1472 = vtanh.f32 %v220_v33 }
 0x21a   :  { %v1473_v35 = vpop.eup %1472 }
 0x21b   :  { %1033 = vmatmul.mubr.f32.vlgmr.msra.gmra.mrb[2].mxu0 %v1473_v35 }
 0x21c   :  { %1343 = vmatpush3.bf16.msra.mxu0 %v1672_v5  ;;  %1102 = vmatprep.mubr.msk.f32.mxu0 %vm1586_vm0, %v1587_v1 }
 0x21d   :  { %1344 = vmatprep.subr.bf16.mxu0 %v1585_v0 }
 0x220   :  { %1346 = vmatpush3.bf16.msra.mxu0 %v1675_v7 }
 0x221   :  { %1347 = vmatprep.subr.bf16.mxu0 %v1585_v0 }
 0x224   :  { %1349 = vmatpush3.bf16.msra.mxu0 %v1681_v10 }
 0x225   :  { %1350 = vmatprep.subr.bf16.mxu0 %v1585_v0 }
 0x228   :  { %1352 = vmatpush3.bf16.msra.mxu0 %v1687_v13 }
 0x229   :  { %1353 = vmatprep.subr.bf16.mxu0 %v1585_v0 }
 0x22c   :  { %1355 = vmatpush3.bf16.msra.mxu0 %v1693_v16 }
 0x22d   :  { %1356 = vmatprep.subr.bf16.mxu0 %v1585_v0 }
 0x230   :  { %1358 = vmatpush3.bf16.msra.mxu0 %v1699_v19 }
 0x231   :  { %1359 = vmatprep.subr.bf16.mxu0 %v1585_v0 }
 0x234   :  { %1361 = vmatpush3.bf16.msra.mxu0 %v1705_v22 }
 0x235   :  { %1362 = vmatprep.subr.bf16.mxu0 %v1585_v0 }
 0x238   :  { %1364 = vmatpush3.bf16.msra.mxu0 %v1711_v25 }
 0x239   :  { %1389 = vmatprep.subr.bf16.mxu0 %v1585_v0 }
 0x2ee   :  { %v290_v37 = vpop.f32.mrb[2].mxu0 }
 0x2ef   :  { %v294_v38 = vadd.f32 %v290_v37, %v223_v36  ;;  %v1034_v39 = vpop.f32.mrb[3].mxu0 }
 0x2f1   :  { %1474 = vtanh.f32 %v294_v38 }
 0x2fb   :  { %v1475_v40 = vpop.eup %1474 }
 0x2fc   :  { %1068 = vmatmul.mubr.f32.vlgmr.msra.gmra.mrb[2].mxu1 %v1475_v40 }
 0x2fd   :  { %1367 = vmatpush3.bf16.msra.mxu1 %v1672_v5  ;;  %1137 = vmatprep.mubr.msk.f32.mxu1 %vm1586_vm0, %v1587_v1 }
 0x2fe   :  { %1368 = vmatprep.subr.bf16.mxu1 %v1585_v0 }
 0x301   :  { %1370 = vmatpush3.bf16.msra.mxu1 %v1675_v7 }
 0x302   :  { %1371 = vmatprep.subr.bf16.mxu1 %v1585_v0 }
 0x305   :  { %1373 = vmatpush3.bf16.msra.mxu1 %v1681_v10 }
 0x306   :  { %1374 = vmatprep.subr.bf16.mxu1 %v1585_v0 }
 0x309   :  { %1376 = vmatpush3.bf16.msra.mxu1 %v1687_v13 }
 0x30a   :  { %1377 = vmatprep.subr.bf16.mxu1 %v1585_v0 }
 0x30d   :  { %1379 = vmatpush3.bf16.msra.mxu1 %v1693_v16 }
 0x30e   :  { %1380 = vmatprep.subr.bf16.mxu1 %v1585_v0 }
 0x311   :  { %1382 = vmatpush3.bf16.msra.mxu1 %v1699_v19 }
 0x312   :  { %1383 = vmatprep.subr.bf16.mxu1 %v1585_v0 }
 0x315   :  { %1385 = vmatpush3.bf16.msra.mxu1 %v1705_v22 }
 0x316   :  { %1386 = vmatprep.subr.bf16.mxu1 %v1585_v0 }
 0x319   :  { %1388 = vmatpush3.bf16.msra.mxu1 %v1711_v25 }
 0x31a   :  { %1413 = vmatprep.subr.bf16.mxu1 %v1585_v0 }
 0x3cf   :  { %v364_v42 = vpop.f32.mrb[2].mxu1 }
 0x3d0   :  { %v368_v43 = vadd.f32 %v364_v42, %v297_v41  ;;  %v1069_v44 = vpop.f32.mrb[3].mxu1 }
 0x3d2   :  { %1476 = vtanh.f32 %v368_v43 }
 0x3dc   :  { %v1477_v45 = vpop.eup %1476 }
 0x3dd   :  { %1103 = vmatmul.mubr.f32.vlgmr.msra.gmra.mrb[4].mxu0 %v1477_v45 }
 0x3de   :  { %1391 = vmatpush3.bf16.msra.mxu0 %v1672_v5  ;;  %1172 = vmatprep.mubr.msk.f32.mxu0 %vm1586_vm0, %v1587_v1 }
 0x3df   :  { %1392 = vmatprep.subr.bf16.mxu0 %v1585_v0 }
 0x3e2   :  { %1394 = vmatpush3.bf16.msra.mxu0 %v1675_v7 }
 0x3e3   :  { %1395 = vmatprep.subr.bf16.mxu0 %v1585_v0 }
 0x3e6   :  { %1397 = vmatpush3.bf16.msra.mxu0 %v1681_v10 }
 0x3e7   :  { %1398 = vmatprep.subr.bf16.mxu0 %v1585_v0 }
 0x3ea   :  { %1400 = vmatpush3.bf16.msra.mxu0 %v1687_v13 }
 0x3eb   :  { %1401 = vmatprep.subr.bf16.mxu0 %v1585_v0 }
 0x3ee   :  { %1403 = vmatpush3.bf16.msra.mxu0 %v1693_v16 }
 0x3ef   :  { %1404 = vmatprep.subr.bf16.mxu0 %v1585_v0 }
 0x3f2   :  { %1406 = vmatpush3.bf16.msra.mxu0 %v1699_v19 }
 0x3f3   :  { %1407 = vmatprep.subr.bf16.mxu0 %v1585_v0 }
 0x3f6   :  { %1409 = vmatpush3.bf16.msra.mxu0 %v1705_v22 }
 0x3f7   :  { %1410 = vmatprep.subr.bf16.mxu0 %v1585_v0 }
 0x3fa   :  { %1412 = vmatpush3.bf16.msra.mxu0 %v1711_v25 }
 0x3fb   :  { %1437 = vmatprep.subr.bf16.mxu0 %v1585_v0 }
 0x4b0   :  { %v438_v47 = vpop.f32.mrb[4].mxu0 }
 0x4b1   :  { %v442_v48 = vadd.f32 %v438_v47, %v371_v46  ;;  %v1104_v49 = vpop.f32.mrb[5].mxu0 }
 0x4b3   :  { %1478 = vtanh.f32 %v442_v48 }
 0x4bd   :  { %v1479_v50 = vpop.eup %1478 }
 0x4be   :  { %1138 = vmatmul.mubr.f32.vlgmr.msra.gmra.mrb[4].mxu1 %v1479_v50 }
 0x4bf   :  { %1415 = vmatpush3.bf16.msra.mxu1 %v1672_v5  ;;  %1207 = vmatprep.mubr.msk.f32.mxu1 %vm1586_vm0, %v1587_v1  ;;  %v1447_v5 = vpack.c.bf16 %v673_v4, %v672_v3 }
 0x4c0   :  { %1416 = vmatprep.subr.bf16.mxu1 %v1585_v0 }
 0x4c3   :  { %1418 = vmatpush3.bf16.msra.mxu1 %v1675_v7 }
 0x4c4   :  { %1419 = vmatprep.subr.bf16.mxu1 %v1585_v0 }
 0x4c7   :  { %1421 = vmatpush3.bf16.msra.mxu1 %v1681_v10 }
 0x4c8   :  { %1422 = vmatprep.subr.bf16.mxu1 %v1585_v0 }
 0x4cb   :  { %1424 = vmatpush3.bf16.msra.mxu1 %v1687_v13  ;;  %v676_v13 = vld [vmem:[#allocation7 + $0x50] sm:$0xff] }
 0x4cc   :  { %1425 = vmatprep.subr.bf16.mxu1 %v1585_v0  ;;  %v1453_v15 = vpack.c.bf16 %v677_v14, %v676_v13 }
 0x4cf   :  { %1427 = vmatpush3.bf16.msra.mxu1 %v1693_v16  ;;  %v678_v16 = vld [vmem:[#allocation7 + $0x60] sm:$0xff] }
 0x4d0   :  { %1428 = vmatprep.subr.bf16.mxu1 %v1585_v0  ;;  %v1456_v18 = vpack.c.bf16 %v679_v17, %v678_v16 }
 0x4d3   :  { %1430 = vmatpush3.bf16.msra.mxu1 %v1699_v19  ;;  %v680_v19 = vld [vmem:[#allocation7 + $0x70] sm:$0xff] }
 0x4d4   :  { %1431 = vmatprep.subr.bf16.mxu1 %v1585_v0  ;;  %v1459_v21 = vpack.c.bf16 %v681_v20, %v680_v19 }
 0x4d7   :  { %1433 = vmatpush3.bf16.msra.mxu1 %v1705_v22  ;;  %v593_v22 = vld [vmem:[#allocation2 + $0x38] sm:$0xff] }
 0x4d8   :  { %1434 = vmatprep.subr.bf16.mxu1 %v1585_v0 }
 0x4db   :  { %1436 = vmatpush3.bf16.msra.mxu1 %v1711_v25 }
 0x591   :  { %v512_v52 = vpop.f32.mrb[4].mxu1 }
 0x592   :  { %v516_v53 = vadd.f32 %v512_v52, %v445_v51  ;;  %v1139_v54 = vpop.f32.mrb[5].mxu1 }
 0x594   :  { %1480 = vtanh.f32 %v516_v53 }
 0x59e   :  { %v1481_v55 = vpop.eup %1480 }
 0x59f   :  { %1173 = vmatmul.mubr.f32.vlgmr.msra.gmra.mrb[6].mxu0 %v1481_v55 }
 0x5a0   :  { %1242 = vmatprep.mubr.msk.f32.mxu0 %vm1586_vm0, %v1587_v1  ;;  %1439 = vmatpush3.bf16.msra.mxu0 %v1438_v59  ;;  %v674_v1 = vld [vmem:[#allocation7 + $0x40] sm:$0xff] }
 0x5a1   :  { %1440 = vmatprep.subr.bf16.mxu0 %v1585_v0  ;;  %v1450_v7 = vpack.c.bf16 %v675_v6, %v674_v1 }
 0x5a4   :  { %1442 = vmatpush3.bf16.msra.mxu0 %v1441_v61 }
 0x5a5   :  { %1443 = vmatprep.subr.bf16.mxu0 %v1585_v0 }
 0x5a8   :  { %1445 = vmatpush3.bf16.msra.mxu0 %v1444_v2 }
 0x5a9   :  { %1446 = vmatprep.subr.bf16.mxu0 %v1585_v0 }
 0x5ac   :  { %1448 = vmatpush3.bf16.msra.mxu0 %v1447_v5 }
 0x5ad   :  { %1449 = vmatprep.subr.bf16.mxu0 %v1585_v0 }
 0x5b0   :  { %1451 = vmatpush3.bf16.msra.mxu0 %v1450_v7 }
 0x5b1   :  { %1452 = vmatprep.subr.bf16.mxu0 %v1585_v0 }
 0x5b4   :  { %1454 = vmatpush3.bf16.msra.mxu0 %v1453_v15 }
 0x5b5   :  { %1455 = vmatprep.subr.bf16.mxu0 %v1585_v0 }
 0x5b8   :  { %1457 = vmatpush3.bf16.msra.mxu0 %v1456_v18 }
 0x5b9   :  { %1458 = vmatprep.subr.bf16.mxu0 %v1585_v0 }
 0x5bc   :  { %1460 = vmatpush3.bf16.msra.mxu0 %v1459_v21 }
 0x672   :  { %v586_v9 = vpop.f32.mrb[6].mxu0 }
 0x673   :  { %v590_v10 = vadd.f32 %v586_v9, %v519_v8  ;;  %v1174_v11 = vpop.f32.mrb[7].mxu0 }
 0x675   :  { %1482 = vtanh.f32 %v590_v10 }
 0x67f   :  { %v1483_v12 = vpop.eup %1482 }
 0x680   :  { %1208 = vmatmul.mubr.f32.vlgmr.msra.gmra.mrb[6].mxu1 %v1483_v12 }
 0x753   :  { %v660_v23 = vpop.f32.mrb[6].mxu1 }
 0x754   :  { %v664_v24 = vadd.f32 %v660_v23, %v593_v22  ;;  %v1209_v25 = vpop.f32.mrb[7].mxu1 }
 0x756   :  { %1484 = vtanh.f32 %v664_v24 }
 0x760   :  { %v1485_v26 = vpop.eup %1484 }
 0x761   :  { %1243 = vmatmul.mubr.f32.vlgmr.msra.gmra.mrb[8].mxu0 %v1485_v26 }
 0x834   :  { %v755_v28 = vpop.f32.mrb[8].mxu0 }
 0x835   :  { %v756_v29 = vadd.f32 %v776_v27, %v755_v28  ;;  %v1244_v30 = vpop.f32.mrb[9].mxu0 }
 0x837   :  { %759 = vst [vmem:[#allocation8] sm:$0xff] %v756_v29 }
 0x838   :  { %1563 = shalt.err (!%p1560_p0)
}
 0x839   :  { %s1564_s5 = scalar_lea.hbm %s1856_s4, 128 }
 0x83a   :  { %p1565_p1 = scmp.ne.s32.totalorder %s1856_s4, %s1564_s5  ;;  %p1568_p2 = scmp.lt.u32.totalorder %s1564_s5, %s1856_s4 }
 0x83c   :  { %p1570_p3 = pnand %p1568_p2, %p1565_p1 }
 0x83e   :  { %1573 = shalt.err (!%p1570_p3)
}
 0x83f   :  { %769 = dma.vmem_to_hbm [thread:$0]  %s767_s27, 128, %s1856_s4, [#allocation4]  }
 0x840   :  { %1578 = dma.done.wait [#allocation4], 128  }
 0x841   :  { %1579 = vsyncadd [#allocation4], 4294967168 }
 0x842   :  { %773 = vsyncpa [#allocation3], 1 }
 0x843   :  { %774 = vsyncpa [#allocation6], 1 }
 0x844   :  { %775 = vsyncpa [#allocation4], 1 }

</bundles_post_ra>
